<compile_context>
chip_gen: v6e
topology: v6e:2x2x1
jax: 0.10.0
libtpu: 0.0.40
codegen_flags: <defaults>
</compile_context>

<pallas_src>
import jax
import jax.numpy as jnp
from jax.experimental import pallas as pl
from jax.experimental.pallas import tpu as pltpu


def _round_up(x, m):
    return (x + m - 1) // m * m


def pendulum_kernel(x_ref, w1_ref, w2_ref, w3_ref, w4_ref, bias_ref, y_ref):
    # fc1 + relu  (f32 matmul; K = raw in_dim, Mosaic pads the lane layout)
    h = jnp.dot(x_ref[...], w1_ref[...], preferred_element_type=jnp.float32)
    h = jnp.maximum(h + bias_ref[0:1, :], 0.0)
    # fc2 + relu  (bf16 MXU operands, f32 accumulation, f32 elementwise)
    h = jnp.dot(h.astype(jnp.bfloat16), w2_ref[...],
                preferred_element_type=jnp.float32)
    h = jnp.maximum(h + bias_ref[1:2, :], 0.0)
    # fc3 + relu
    h = jnp.dot(h.astype(jnp.bfloat16), w3_ref[...],
                preferred_element_type=jnp.float32)
    h = jnp.maximum(h + bias_ref[2:3, :], 0.0)
    # fc4 (no activation)
    y = jnp.dot(h.astype(jnp.bfloat16), w4_ref[...],
                preferred_element_type=jnp.float32)
    y_ref[...] = y + bias_ref[3:4, :]


def prepare_params(params):
    """One-time padding / packing / casting of parameters. Cache the result."""
    w1, b1 = params["w1"], params["b1"]
    w2, b2 = params["w2"], params["b2"]
    w3, b3 = params["w3"], params["b3"]
    w4, b4 = params["w4"], params["b4"]
    log_std = params["log_std"]

    in_dim, hid = w1.shape
    out_dim = w4.shape[1]
    W = _round_up(max(hid, out_dim), 128)   # common padded feature width

    def pad2(a, rows, cols, dtype):
        return jnp.pad(
            a, ((0, rows - a.shape[0]), (0, cols - a.shape[1]))).astype(dtype)

    # Pack b1..b4 into one (8, W) f32 array (one bias per row, rows 4-7 unused).
    bias_pack = jnp.zeros((8, W), jnp.float32)
    bias_pack = bias_pack.at[0, :hid].set(b1)
    bias_pack = bias_pack.at[1, :hid].set(b2)
    bias_pack = bias_pack.at[2, :hid].set(b3)
    bias_pack = bias_pack.at[3, :out_dim].set(b4)

    return {
        "in_dim": in_dim,
        "out_dim": out_dim,
        "W": W,
        # layer 1 kept f32 (tiny; unpadded K handled by Mosaic)
        "w1": pad2(w1, in_dim, W, jnp.float32),
        # layers 2-4: bf16 MXU operands (halves weight DMA bytes / VMEM)
        "w2": pad2(w2, W, W, jnp.bfloat16),
        "w3": pad2(w3, W, W, jnp.bfloat16),
        "w4": pad2(w4, W, W, jnp.bfloat16),
        "bias": bias_pack,
        # batch-independent second output, computed once here (not in-kernel)
        "vout": jnp.exp(log_std.astype(jnp.float32)),
    }


def pendulum_forward(x, prepared):
    """x: (B, in_dim) f32. prepared: output of prepare_params(). -> (y, vout)."""
    B, in_dim = x.shape
    assert in_dim == prepared["in_dim"]
    W = prepared["W"]
    out_dim = prepared["out_dim"]

    # Only the batch dim may need rounding (sublane multiple of 8).
    Bp = _round_up(max(B, 1), 8)
    x_p = x if Bp == B else jnp.pad(x, ((0, Bp - B), (0, 0)))

    vmem = pltpu.MemorySpace.VMEM
    full = lambda: pl.BlockSpec(memory_space=vmem)

    y_p = pl.pallas_call(
        pendulum_kernel,
        out_shape=jax.ShapeDtypeStruct((Bp, W), jnp.float32),
        in_specs=[full() for _ in range(6)],
        out_specs=full(),
    )(x_p, prepared["w1"], prepared["w2"], prepared["w3"], prepared["w4"],
      prepared["bias"])

    return y_p[:B, :out_dim], prepared["vout"]


def init_params(key, in_dim, out_dim, hid=90):
    """Deterministic PyTorch-style init: U(-1/sqrt(fan_in), 1/sqrt(fan_in))."""
    keys = jax.random.split(key, 8)
    dims = [(in_dim, hid), (hid, hid), (hid, hid), (hid, out_dim)]
    params = {}
    for i, (fin, fout) in enumerate(dims, start=1):
        bound = 1.0 / jnp.sqrt(jnp.float32(fin))
        params[f"w{i}"] = jax.random.uniform(
            keys[2 * (i - 1)], (fin, fout), jnp.float32, -bound, bound)
        params[f"b{i}"] = jax.random.uniform(
            keys[2 * (i - 1) + 1], (fout,), jnp.float32, -bound, bound)
    # log_std = -0.5 * ones(output)  (as in the PyTorch __init__)
    params["log_std"] = jnp.full((out_dim,), -0.5, dtype=jnp.float32)
    return params


if __name__ == "__main__":
    key = jax.random.PRNGKey(0)
    in_dim, out_dim, batch = 3, 1, 8   # Pendulum-v1: obs dim 3, action dim 1

    pkey, xkey = jax.random.split(key)
    params = init_params(pkey, in_dim, out_dim)
    prepared = prepare_params(params)          # one-time pad / pack / cast
    jax.block_until_ready(prepared)
    x = jax.random.normal(xkey, (batch, in_dim), dtype=jnp.float32)

    y, vout = pendulum_forward(x, prepared)
    jax.block_until_ready((y, vout))

    assert y.shape == (batch, out_dim) and y.dtype == jnp.float32
    assert vout.shape == (out_dim,) and vout.dtype == jnp.float32

    # Pure-JAX f32 reference; bf16 weights in layers 2-4 -> loosened tolerance.
    def ref(xx, p):
        h = jnp.maximum(xx @ p["w1"] + p["b1"], 0.0)
        h = jnp.maximum(h @ p["w2"] + p["b2"], 0.0)
        h = jnp.maximum(h @ p["w3"] + p["b3"], 0.0)
        return h @ p["w4"] + p["b4"], jnp.exp(p["log_std"])

    y_ref, v_ref = ref(x, params)
    assert jnp.allclose(y, y_ref, atol=5e-2, rtol=5e-2)
    assert jnp.allclose(vout, v_ref, atol=1e-6, rtol=1e-6)

    print("KERNEL_OK")
</pallas_src>

<mosaic_0001>
module attributes {stable_mosaic.version = 11 : i64} {
  func.func @pendulum_kernel(%arg0: memref<8x3xf32, #tpu.memory_space<vmem>>, %arg1: memref<3x128xf32, #tpu.memory_space<vmem>>, %arg2: memref<128x128xbf16, #tpu.memory_space<vmem>>, %arg3: memref<128x128xbf16, #tpu.memory_space<vmem>>, %arg4: memref<128x128xbf16, #tpu.memory_space<vmem>>, %arg5: memref<8x128xf32, #tpu.memory_space<vmem>>, %arg6: memref<8x128xf32, #tpu.memory_space<vmem>>) attributes {dimension_semantics = [], scalar_prefetch = 0 : i64, scratch_operands = 0 : i64, tpu.core_type = #tpu.core_type<tc>} {
    %c0 = arith.constant 0 : index
    %c0_0 = arith.constant 0 : index
    %0 = vector.load %arg0[%c0, %c0_0] : memref<8x3xf32, #tpu.memory_space<vmem>>, vector<8x3xf32>
    %c0_1 = arith.constant 0 : index
    %c0_2 = arith.constant 0 : index
    %1 = vector.load %arg1[%c0_1, %c0_2] : memref<3x128xf32, #tpu.memory_space<vmem>>, vector<3x128xf32>
    %cst = arith.constant dense<0.000000e+00> : vector<8x128xf32>
    %2 = tpu.matmul %0, %1, %cst {dimension_numbers = #tpu.dot_dimension_numbers<[1], [0], [0], [1], [0, 0, 1, 1], [], []>} : vector<8x3xf32>, vector<3x128xf32>, vector<8x128xf32> -> vector<8x128xf32>
    %c0_3 = arith.constant 0 : index
    %c0_4 = arith.constant 0 : index
    %3 = vector.load %arg5[%c0_3, %c0_4] : memref<8x128xf32, #tpu.memory_space<vmem>>, vector<1x128xf32>
    %4 = vector.broadcast %3 : vector<1x128xf32> to vector<8x128xf32>
    %5 = arith.addf %2, %4 : vector<8x128xf32>
    %cst_5 = arith.constant 0.000000e+00 : f32
    %6 = vector.broadcast %cst_5 : f32 to vector<8x128xf32>
    %7 = arith.maximumf %5, %6 : vector<8x128xf32>
    %8 = arith.truncf %7 : vector<8x128xf32> to vector<8x128xbf16>
    %c0_6 = arith.constant 0 : index
    %c0_7 = arith.constant 0 : index
    %9 = vector.load %arg2[%c0_6, %c0_7] : memref<128x128xbf16, #tpu.memory_space<vmem>>, vector<128x128xbf16>
    %cst_8 = arith.constant dense<0.000000e+00> : vector<8x128xf32>
    %10 = tpu.matmul %8, %9, %cst_8 {dimension_numbers = #tpu.dot_dimension_numbers<[1], [0], [0], [1], [0, 0, 1, 1], [], []>} : vector<8x128xbf16>, vector<128x128xbf16>, vector<8x128xf32> -> vector<8x128xf32>
    %c1 = arith.constant 1 : index
    %c0_9 = arith.constant 0 : index
    %11 = vector.load %arg5[%c1, %c0_9] : memref<8x128xf32, #tpu.memory_space<vmem>>, vector<1x128xf32>
    %12 = vector.broadcast %11 : vector<1x128xf32> to vector<8x128xf32>
    %13 = arith.addf %10, %12 : vector<8x128xf32>
    %cst_10 = arith.constant 0.000000e+00 : f32
    %14 = vector.broadcast %cst_10 : f32 to vector<8x128xf32>
    %15 = arith.maximumf %13, %14 : vector<8x128xf32>
    %16 = arith.truncf %15 : vector<8x128xf32> to vector<8x128xbf16>
    %c0_11 = arith.constant 0 : index
    %c0_12 = arith.constant 0 : index
    %17 = vector.load %arg3[%c0_11, %c0_12] : memref<128x128xbf16, #tpu.memory_space<vmem>>, vector<128x128xbf16>
    %cst_13 = arith.constant dense<0.000000e+00> : vector<8x128xf32>
    %18 = tpu.matmul %16, %17, %cst_13 {dimension_numbers = #tpu.dot_dimension_numbers<[1], [0], [0], [1], [0, 0, 1, 1], [], []>} : vector<8x128xbf16>, vector<128x128xbf16>, vector<8x128xf32> -> vector<8x128xf32>
    %c2 = arith.constant 2 : index
    %c0_14 = arith.constant 0 : index
    %19 = vector.load %arg5[%c2, %c0_14] : memref<8x128xf32, #tpu.memory_space<vmem>>, vector<1x128xf32>
    %20 = vector.broadcast %19 : vector<1x128xf32> to vector<8x128xf32>
    %21 = arith.addf %18, %20 : vector<8x128xf32>
    %cst_15 = arith.constant 0.000000e+00 : f32
    %22 = vector.broadcast %cst_15 : f32 to vector<8x128xf32>
    %23 = arith.maximumf %21, %22 : vector<8x128xf32>
    %24 = arith.truncf %23 : vector<8x128xf32> to vector<8x128xbf16>
    %c0_16 = arith.constant 0 : index
    %c0_17 = arith.constant 0 : index
    %25 = vector.load %arg4[%c0_16, %c0_17] : memref<128x128xbf16, #tpu.memory_space<vmem>>, vector<128x128xbf16>
    %cst_18 = arith.constant dense<0.000000e+00> : vector<8x128xf32>
    %26 = tpu.matmul %24, %25, %cst_18 {dimension_numbers = #tpu.dot_dimension_numbers<[1], [0], [0], [1], [0, 0, 1, 1], [], []>} : vector<8x128xbf16>, vector<128x128xbf16>, vector<8x128xf32> -> vector<8x128xf32>
    %c3 = arith.constant 3 : index
    %c0_19 = arith.constant 0 : index
    %27 = vector.load %arg5[%c3, %c0_19] : memref<8x128xf32, #tpu.memory_space<vmem>>, vector<1x128xf32>
    %28 = vector.broadcast %27 : vector<1x128xf32> to vector<8x128xf32>
    %29 = arith.addf %26, %28 : vector<8x128xf32>
    %c0_20 = arith.constant 0 : index
    %c0_21 = arith.constant 0 : index
    %30 = vector.load %arg6[%c0_20, %c0_21] : memref<8x128xf32, #tpu.memory_space<vmem>>, vector<8x128xf32>
    tpu.vector_store %arg6[%c0_20, %c0_21], %29 {strides = array<i32>} : memref<8x128xf32, #tpu.memory_space<vmem>>, vector<8x128xf32>,
    return
  }
}

</mosaic_0001>

<bundles_post_ra>
// kernel: tpu_custom_call.1
= control target key start
LH: loop header
LB: loop body
LE: loop exit
PB: predicated region body
PF: predicated region fallthrough
CT: control target
= control target key end

     0   :  { %11 = vsyncpa [#allocation3], 0  ;;  %s849_s0 = inlined_call_operand.vmem [shape: f32[8,3], index: 0, kind: input, shape index: {}]   ;;  %s850_s1 = inlined_call_operand.vmem [shape: f32[3,128], index: 1, kind: input, shape index: {}]   ;;  %s851_s2 = inlined_call_operand.hbm [shape: bf16[128,128], index: 2, kind: input, shape index: {}]   ;;  %s852_s3 = inlined_call_operand.hbm [shape: bf16[128,128], index: 3, kind: input, shape index: {}]   ;;  %s853_s4 = inlined_call_operand.hbm [shape: bf16[128,128], index: 4, kind: input, shape index: {}]   ;;  %s854_s5 = inlined_call_operand.vmem [shape: f32[8,128], index: 5, kind: input, shape index: {}]   ;;  %s855_s6 = inlined_call_operand.hbm [shape: f32[8,128], index: 6, kind: output, shape index: {}]  }
   0x1   :  { %12 = vsyncpa [#allocation6], 0 }
   0x2   :  { %13 = vsyncpa [#allocation4], 0  ;;  %s743_s21 = smov [#allocation5]   ;;  %s744_s23 = smov [#allocation2]  }
   0x3   :  { %s35_s22 = sshll.u32 %s743_s21, 4  ;;  %s23_s24 = sshll.u32 %s744_s23, 4  ;;  %s36_s22 = int_to_ptr.vmem [resolvable:$true] %s35_s22  ;;  %s24_s24 = int_to_ptr.vmem [resolvable:$true] %s23_s24 }
   0x4   :  { %s665_s25 = scalar_lea.vmem %s36_s22, 1024  ;;  %p670_p1 = scmp.lt.s32.totalorder %s36_s22, %s36_s22 }
   0x5   :  { %p666_p0 = scmp.ne.s32.totalorder %s36_s22, %s665_s25  ;;  %p671_p2 = scmp.lt.s32.totalorder %s665_s25, %s665_s25 }
   0x7   :  { %p672_p3 = por %p671_p2, %p670_p1 }
   0x9   :  { %p673_p4 = pnand %p672_p3, %p666_p0 }
   0xb   :  { %676 = shalt.err (!%p673_p4)
}
   0xc   :  { %s745_s26 = smov 64   ;;  %s746_s27 = smov 4  }
   0xd   :  { %41 = dma.hbm_to_vmem [thread:$0]  %s852_s3, 1024, %s36_s22, [#allocation6], %s745_s26, %s745_s26, %s746_s27  }
   0xe   :  { %s685_s30 = scalar_lea.vmem %s24_s24, 1024  ;;  %p690_p6 = scmp.lt.s32.totalorder %s24_s24, %s24_s24 }
   0xf   :  { %p686_p5 = scmp.ne.s32.totalorder %s24_s24, %s685_s30  ;;  %p691_p7 = scmp.lt.s32.totalorder %s685_s30, %s685_s30 }
  0x11   :  { %p692_p8 = por %p691_p7, %p690_p6 }
  0x13   :  { %p693_p9 = pnand %p692_p8, %p686_p5 }
  0x15   :  { %696 = shalt.err (!%p693_p9)
}
  0x16   :  { %29 = dma.hbm_to_vmem [thread:$0]  %s851_s2, 1024, %s24_s24, [#allocation3], %s745_s26, %s745_s26, %s746_s27  }
  0x17   :  { %s747_s9 = smov [#allocation7]  }
  0x18   :  { %s47_s10 = sshll.u32 %s747_s9, 4  ;;  %s48_s10 = int_to_ptr.vmem [resolvable:$true] %s47_s10 }
  0x19   :  { %s705_s11 = scalar_lea.vmem %s48_s10, 1024  ;;  %p710_p11 = scmp.lt.s32.totalorder %s48_s10, %s48_s10 }
  0x1a   :  { %p706_p10 = scmp.ne.s32.totalorder %s48_s10, %s705_s11  ;;  %p711_p12 = scmp.lt.s32.totalorder %s705_s11, %s705_s11 }
  0x1c   :  { %p712_p13 = por %p711_p12, %p710_p11 }
  0x1e   :  { %p713_p0 = pnand %p712_p13, %p706_p10 }
  0x20   :  { %716 = shalt.err (!%p713_p0)
}
  0x21   :  { %53 = dma.hbm_to_vmem [thread:$0]  %s853_s4, 1024, %s48_s10, [#allocation6], %s745_s26, %s745_s26, %s746_s27  }
  0x22   :  { %737 = dma.done.wait [#allocation3], 1024  }
  0x23   :  { %738 = vsyncadd [#allocation3], 4294966272 }
  0x24   :  { %739 = dma.done.wait [#allocation6], 2048  }
  0x25   :  { %740 = vsyncadd [#allocation6], 4294965248  ;;  %v748_v0 = vmov 0.0   ;;  %vm749_vm0 = vmmov 0   ;;  %vm77_vm1 = vcmask 1042432   ;;  %vm73_vm2 = vcmask 23552  }
  0x26   :  { %560 = vmatprep.subr.mxu0 %v748_v0  ;;  %562 = vmatprep.mubr.msk.f32.mxu0 %vm749_vm0, %v748_v0  ;;  %v67_v1 = vld [vmem:[%s850_s1] sm:$0x7]  ;;  %v633_v3 = vld [vmem:[#allocation2 + $0x38] sm:$0xff]   ;;  %v634_v4 = vld [vmem:[#allocation2 + $0x30] sm:$0xff]   ;;  %s750_s21 = smov [#allocation8]  }
  0x27   :  { %565 = vmatprep.subr.bf16.mxu1 %v748_v0  ;;  %581 = vmatprep.mubr.msk.bf16.mxu1 %vm749_vm0, %v748_v0  ;;  %v66_v2 = vld [vmem:[%s849_s0] sm:$0xff]  ;;  %v635_v5 = vld [vmem:[#allocation2 + $0x28] sm:$0xff]   ;;  %v637_v7 = vld [vmem:[#allocation2 + $0x18] sm:$0xff]   ;;  %s491_s22 = sshll.u32 %s750_s21, 4  ;;  %s492_s22 = int_to_ptr.vmem [resolvable:$true] %s491_s22 }
  0x28   :  { %561 = vmatpush3.msk.msra.mxu0 %vm77_vm1, %v67_v1  ;;  %566 = vmatpush3.bf16.msra.mxu1 %v633_v3  ;;  %v636_v6 = vld [vmem:[#allocation2 + $0x20] sm:$0xff]   ;;  %v638_v8 = vld [vmem:[#allocation2 + $0x10] sm:$0xff]   ;;  %v639_v9 = vld [vmem:[#allocation2 + $0x8] sm:$0xff]   ;;  %s717_s23 = scalar_lea.vmem %s492_s22, 128  ;;  %p722_p2 = scmp.lt.s32.totalorder %s492_s22, %s492_s22 }
  0x29   :  { %563 = vmatmul.mubr.msk.f32.vlgmr.msra.gmra.mxu0 %vm73_vm2, %v66_v2  ;;  %585 = vmatprep.subr.bf16.mxu0 %v748_v0  ;;  %v640_v10 = vld [vmem:[#allocation2] sm:$0xff]   ;;  %v641_v11 = vld [vmem:[#allocation5 + $0x38] sm:$0xff]   ;;  %v642_v12 = vld [vmem:[#allocation5 + $0x30] sm:$0xff]   ;;  %p718_p1 = scmp.ne.s32.totalorder %s492_s22, %s717_s23  ;;  %p723_p3 = scmp.lt.s32.totalorder %s717_s23, %s717_s23 }
  0x2a   :  { %601 = vmatprep.mubr.msk.bf16.mxu0 %vm749_vm0, %v748_v0  ;;  %567 = vmatprep.subr.bf16.mxu1 %v748_v0  ;;  %v643_v13 = vld [vmem:[#allocation5 + $0x28] sm:$0xff]   ;;  %v644_v14 = vld [vmem:[#allocation5 + $0x20] sm:$0xff]   ;;  %v645_v15 = vld [vmem:[#allocation5 + $0x18] sm:$0xff]  }
  0x2b   :  { %586 = vmatpush3.bf16.msra.mxu0 %v641_v11  ;;  %v646_v16 = vld [vmem:[#allocation5 + $0x10] sm:$0xff]   ;;  %v501_v17 = vld [vmem:[%s854_s5] ss:$0 sm:$0xff]  ;;  %v647_v23 = vld [vmem:[#allocation5 + $0x8] sm:$0xff]   ;;  %p724_p4 = por %p723_p3, %p722_p2 }
  0x2c   :  { %568 = vmatpush3.bf16.msra.mxu1 %v634_v4  ;;  %587 = vmatprep.subr.bf16.mxu0 %v748_v0  ;;  %v648_v24 = vld [vmem:[#allocation5] sm:$0xff]   ;;  %v649_v25 = vld [vmem:[#allocation7 + $0x38] sm:$0xff]   ;;  %v650_v26 = vld [vmem:[#allocation7 + $0x30] sm:$0xff]  }
  0x2d   :  { %569 = vmatprep.subr.bf16.mxu1 %v748_v0  ;;  %v651_v27 = vld [vmem:[#allocation7 + $0x28] sm:$0xff]   ;;  %v652_v28 = vld [vmem:[#allocation7 + $0x20] sm:$0xff]   ;;  %v653_v29 = vld [vmem:[#allocation7 + $0x18] sm:$0xff]   ;;  %p725_p5 = pnand %p724_p4, %p718_p1 }
  0x2e   :  { %v654_v30 = vld [vmem:[#allocation7 + $0x10] sm:$0xff]   ;;  %v504_v31 = vld [vmem:[%s854_s5 + $0x1] ss:$0 sm:$0xff]  ;;  %v655_v39 = vld [vmem:[#allocation7 + $0x8] sm:$0xff]  }
  0x2f   :  { %588 = vmatpush3.bf16.msra.mxu0 %v642_v12  ;;  %v656_v40 = vld [vmem:[#allocation7] sm:$0xff]  }
  0x30   :  { %570 = vmatpush3.bf16.msra.mxu1 %v635_v5  ;;  %589 = vmatprep.subr.bf16.mxu0 %v748_v0  ;;  %v513_v41 = vld [vmem:[%s854_s5 + $0x2] ss:$0 sm:$0xff]  ;;  %v522_v49 = vld [vmem:[%s854_s5 + $0x3] ss:$0 sm:$0xff] }
  0x31   :  { %571 = vmatprep.subr.bf16.mxu1 %v748_v0 }
  0x33   :  { %590 = vmatpush3.bf16.msra.mxu0 %v643_v13 }
  0x34   :  { %572 = vmatpush3.bf16.msra.mxu1 %v636_v6  ;;  %591 = vmatprep.subr.bf16.mxu0 %v748_v0 }
  0x35   :  { %573 = vmatprep.subr.bf16.mxu1 %v748_v0 }
  0x37   :  { %592 = vmatpush3.bf16.msra.mxu0 %v644_v14 }
  0x38   :  { %574 = vmatpush3.bf16.msra.mxu1 %v637_v7  ;;  %593 = vmatprep.subr.bf16.mxu0 %v748_v0 }
  0x39   :  { %575 = vmatprep.subr.bf16.mxu1 %v748_v0 }
  0x3b   :  { %594 = vmatpush3.bf16.msra.mxu0 %v645_v15 }
  0x3c   :  { %576 = vmatpush3.bf16.msra.mxu1 %v638_v8  ;;  %595 = vmatprep.subr.bf16.mxu0 %v748_v0 }
  0x3d   :  { %577 = vmatprep.subr.bf16.mxu1 %v748_v0 }
  0x3f   :  { %596 = vmatpush3.bf16.msra.mxu0 %v646_v16 }
  0x40   :  { %578 = vmatpush3.bf16.msra.mxu1 %v639_v9  ;;  %597 = vmatprep.subr.bf16.mxu0 %v748_v0 }
  0x41   :  { %579 = vmatprep.subr.bf16.mxu1 %v748_v0 }
  0x43   :  { %598 = vmatpush3.bf16.msra.mxu0 %v647_v23 }
  0x44   :  { %580 = vmatpush3.bf16.msra.mxu1 %v640_v10  ;;  %599 = vmatprep.subr.bf16.mxu0 %v748_v0 }
  0x45   :  { %605 = vmatprep.subr.bf16.mxu1 %v748_v0 }
  0x47   :  { %600 = vmatpush3.bf16.msra.mxu0 %v648_v24 }
  0xe9   :  { %v147_v18 = vpop.f32.mrf.mxu0 }
  0xea   :  { %v148_v19 = vadd.f32 %v501_v17, %v147_v18 }
  0xeb   :  { %v564_v20 = vpop.f32.mrf.mxu0 }
  0xec   :  { %v151_v21 = vmax.f32 %v148_v19, 0.0 }
  0xee   :  { %v152_v22 = vpack.c.bf16 %v151_v21, %v151_v21 }
  0xf0   :  { %582 = vmatmul.mubr.bf16.vlgmr.msra.gmra.mxu1 %v152_v22 }
  0xf1   :  { %621 = vmatprep.mubr.msk.bf16.mxu1 %vm749_vm0, %v748_v0  ;;  %606 = vmatpush3.bf16.msra.mxu1 %v649_v25 }
  0xf2   :  { %607 = vmatprep.subr.bf16.mxu1 %v748_v0 }
  0xf5   :  { %608 = vmatpush3.bf16.msra.mxu1 %v650_v26 }
  0xf6   :  { %609 = vmatprep.subr.bf16.mxu1 %v748_v0 }
  0xf9   :  { %610 = vmatpush3.bf16.msra.mxu1 %v651_v27 }
  0xfa   :  { %611 = vmatprep.subr.bf16.mxu1 %v748_v0 }
  0xfd   :  { %612 = vmatpush3.bf16.msra.mxu1 %v652_v28 }
  0xfe   :  { %613 = vmatprep.subr.bf16.mxu1 %v748_v0 }
 0x101   :  { %614 = vmatpush3.bf16.msra.mxu1 %v653_v29 }
 0x102   :  { %615 = vmatprep.subr.bf16.mxu1 %v748_v0 }
 0x105   :  { %616 = vmatpush3.bf16.msra.mxu1 %v654_v30 }
 0x106   :  { %617 = vmatprep.subr.bf16.mxu1 %v748_v0 }
 0x109   :  { %618 = vmatpush3.bf16.msra.mxu1 %v655_v39 }
 0x10a   :  { %619 = vmatprep.subr.bf16.mxu1 %v748_v0 }
 0x10d   :  { %620 = vmatpush3.bf16.msra.mxu1 %v656_v40 }
 0x1b0   :  { %v256_v32 = vpop.f32.mrf.mxu1 }
 0x1b1   :  { %v257_v33 = vadd.f32 %v504_v31, %v256_v32 }
 0x1b2   :  { %v583_v34 = vpop.f32.mrf.mxu1 }
 0x1b3   :  { %v262_v35 = vmax.f32 %v257_v33, 0.0 }
 0x1b4   :  { %v259_v36 = vpop.f32.mrf.mxu1 }
 0x1b5   :  { %v263_v37 = vpack.c.bf16 %v262_v35, %v262_v35 }
 0x1b6   :  { %v584_v38 = vpop.f32.mrf.mxu1 }
 0x1b7   :  { %602 = vmatmul.mubr.bf16.vlgmr.msra.gmra.mxu0 %v263_v37 }
 0x277   :  { %v367_v42 = vpop.f32.mrf.mxu0 }
 0x278   :  { %v368_v43 = vadd.f32 %v513_v41, %v367_v42 }
 0x279   :  { %v603_v44 = vpop.f32.mrf.mxu0 }
 0x27a   :  { %v373_v45 = vmax.f32 %v368_v43, 0.0 }
 0x27b   :  { %v370_v46 = vpop.f32.mrf.mxu0 }
 0x27c   :  { %v374_v47 = vpack.c.bf16 %v373_v45, %v373_v45 }
 0x27d   :  { %v604_v48 = vpop.f32.mrf.mxu0 }
 0x27e   :  { %622 = vmatmul.mubr.bf16.vlgmr.msra.gmra.mxu1 %v374_v47 }
 0x33e   :  { %v478_v50 = vpop.f32.mrf.mxu1 }
 0x33f   :  { %v479_v51 = vadd.f32 %v522_v49, %v478_v50 }
 0x340   :  { %v623_v52 = vpop.f32.mrf.mxu1 }
 0x341   :  { %484 = vst [vmem:[#allocation8] sm:$0xff] %v479_v51 }
 0x342   :  { %v481_v53 = vpop.f32.mrf.mxu1 }
 0x343   :  { %728 = shalt.err (!%p725_p5)
}
 0x344   :  { %494 = dma.vmem_to_hbm [thread:$0]  %s492_s22, 128, %s855_s6, [#allocation4]   ;;  %v624_v54 = vpop.f32.mrf.mxu1 }
 0x345   :  { %741 = dma.done.wait [#allocation4], 128  }
 0x346   :  { %742 = vsyncadd [#allocation4], 4294967168 }
 0x347   :  { %498 = vsyncpa [#allocation3], 1 }
 0x348   :  { %499 = vsyncpa [#allocation6], 1 }
 0x349   :  { %500 = vsyncpa [#allocation4], 1 }

</bundles_post_ra>
